<compile_context>
chip_gen: v7x
topology: tpu7x:2x2x1
jax: 0.10.0
libtpu: 0.0.40
codegen_flags: <defaults>
</compile_context>

<pallas_src>
import jax
import jax.numpy as jnp
from jax.experimental import pallas as pl
from jax.experimental.pallas import tpu as pltpu

FC1_IN = 23
FC2_IN = 32
N_ACTIONS = 6            # bomberman: UP, DOWN, LEFT, RIGHT, WAIT, BOMB
MIN_TILE_ROWS = 8        # sublane granularity
TILE_B_MAX = 2048        # rows per grid step; VMEM is nowhere near binding
SMALL_BATCH_CUTOFF = 64  # below this, plain JAX beats kernel dispatch overhead
EVEN_TILE_CUTOFF = 64    # batches >= this get an even tile count (v7x megacore)


def _cdiv(a, b):
    return -(-a // b)


def _round_up(n, m):
    return ((n + m - 1) // m) * m


def _policy_net_kernel(x_ref, w1_ref, b1_ref, w2_ref, b2_ref, o_ref):
    # fc1 (+ bias, ReLU) — MXU accumulates in f32 regardless of input dtype.
    h = jnp.dot(x_ref[...], w1_ref[...], preferred_element_type=jnp.float32)
    h = jnp.maximum(h + b1_ref[...], 0.0)
    # fc2 (+ bias) — h stays f32, W2 is f32 (VMEM-resident, bf16 gains nothing).
    y = jnp.dot(h, w2_ref[...], preferred_element_type=jnp.float32)
    o_ref[...] = (y + b2_ref[...]).astype(o_ref.dtype)


def _dense_forward(x, params):
    """Plain-JAX fused forward for tiny batches (avoids kernel dispatch cost)."""
    h = jnp.maximum(x @ params["w1"] + params["b1"].reshape(1, -1), 0.0)
    return h @ params["w2"] + params["b2"].reshape(1, -1)


def _choose_batch_tiling(batch, tile_b_max):
    """Adaptive tile size: small row padding, even tile count for v7x megacore."""
    n_tiles = max(1, _cdiv(batch, tile_b_max))
    if batch >= EVEN_TILE_CUTOFF:
        n_tiles = max(2, n_tiles)
        if n_tiles % 2:
            n_tiles += 1
    tb = _round_up(_cdiv(batch, n_tiles), MIN_TILE_ROWS)
    padded_b = tb * n_tiles
    return tb, n_tiles, padded_b


def _pallas_forward(x, params, *, use_bf16, tile_b):
    batch = x.shape[0]
    n_actions = params["w2"].shape[1]
    in_dtype = jnp.bfloat16 if use_bf16 else jnp.float32

    tb, n_tiles, padded_b = _choose_batch_tiling(batch, tile_b)

    # Streamed operand: cast (only if needed) and pad rows only (no lane pad).
    xp = x if x.dtype == in_dtype else x.astype(in_dtype)
    if padded_b != batch:
        xp = jnp.pad(xp, ((0, padded_b - batch), (0, 0)))

    # VMEM-resident small operands: W1 matches x's dtype for the MXU; the rest
    # stay f32 (no column padding anywhere).
    w1 = params["w1"].astype(in_dtype)
    b1 = params["b1"].reshape(1, FC2_IN).astype(jnp.float32)
    w2 = params["w2"].astype(jnp.float32)
    b2 = params["b2"].reshape(1, n_actions).astype(jnp.float32)

    itemsize = jnp.dtype(in_dtype).itemsize
    cost = pl.CostEstimate(
        flops=2 * padded_b * (FC1_IN * FC2_IN + FC2_IN * n_actions),
        transcendentals=0,
        bytes_accessed=(padded_b * (FC1_IN * itemsize + 4 * n_actions)
                        + FC1_IN * FC2_IN * itemsize
                        + 4 * (FC2_IN + FC2_IN * n_actions + n_actions)),
    )

    out = pl.pallas_call(
        _policy_net_kernel,
        out_shape=jax.ShapeDtypeStruct((padded_b, n_actions), jnp.float32),
        grid=(n_tiles,),
        in_specs=[
            pl.BlockSpec((tb, FC1_IN), lambda i: (i, 0)),        # x tile (unpadded lanes)
            pl.BlockSpec((FC1_IN, FC2_IN), lambda i: (0, 0)),    # W1 (resident)
            pl.BlockSpec((1, FC2_IN), lambda i: (0, 0)),         # b1 (resident)
            pl.BlockSpec((FC2_IN, n_actions), lambda i: (0, 0)),  # W2 (resident)
            pl.BlockSpec((1, n_actions), lambda i: (0, 0)),      # b2 (resident)
        ],
        out_specs=pl.BlockSpec((tb, n_actions), lambda i: (i, 0)),
        compiler_params=pltpu.CompilerParams(
            dimension_semantics=("parallel",),   # megacore sharding on v7x
        ),
        cost_estimate=cost,
    )(xp, w1, b1, w2, b2)

    return out[:batch] if padded_b != batch else out


def policy_net_forward(x, params, *, use_pallas=None, use_bf16=False,
                       tile_b=TILE_B_MAX):
    """Forward pass of PolicyNet.

    x: array of shape (..., 23) or flat (23,); flattened to (-1, 23) exactly
       like `x.view(-1, fc1_in)` in the PyTorch module.
    Returns logits of shape (B, n_actions), squeezed to (n_actions,) if B == 1.
    """
    x = jnp.asarray(x)
    if not jnp.issubdtype(x.dtype, jnp.floating):
        x = x.astype(jnp.float32)
    if x.ndim == 1:
        x = x[None, :]
    x = x.reshape(-1, FC1_IN)
    batch = x.shape[0]

    if use_pallas is None:
        use_pallas = batch >= SMALL_BATCH_CUTOFF

    if use_pallas:
        y = _pallas_forward(x, params, use_bf16=use_bf16, tile_b=tile_b)
    else:
        y = _dense_forward(x.astype(jnp.float32), params)

    if y.shape[0] == 1:
        y = y[0]
    return y


def init_params(key, n_actions=N_ACTIONS):
    """Deterministic init mimicking torch.nn.Linear default U(-1/sqrt(fan_in), +)."""
    k1, k2, k3, k4 = jax.random.split(key, 4)
    bound1 = 1.0 / jnp.sqrt(jnp.float32(FC1_IN))
    bound2 = 1.0 / jnp.sqrt(jnp.float32(FC2_IN))
    # Stored as (in, out): transpose of PyTorch's (out, in) weight layout.
    w1 = jax.random.uniform(k1, (FC1_IN, FC2_IN), jnp.float32, -bound1, bound1)
    b1 = jax.random.uniform(k2, (1, FC2_IN), jnp.float32, -bound1, bound1)
    w2 = jax.random.uniform(k3, (FC2_IN, n_actions), jnp.float32, -bound2, bound2)
    b2 = jax.random.uniform(k4, (1, n_actions), jnp.float32, -bound2, bound2)
    return {"w1": w1, "b1": b1, "w2": w2, "b2": b2}


def _reference_forward(x, params):
    """Plain-JAX reference for correctness checks."""
    x = jnp.asarray(x, jnp.float32)
    if x.ndim == 1:
        x = x[None, :]
    x = x.reshape(-1, FC1_IN)
    h = jnp.maximum(x @ params["w1"] + params["b1"].reshape(1, -1), 0.0)
    y = h @ params["w2"] + params["b2"].reshape(1, -1)
    if y.shape[0] == 1:
        y = y[0]
    return y


if __name__ == "__main__":
    key = jax.random.PRNGKey(0)
    pkey, k1, k2, k3 = jax.random.split(key, 4)
    params = init_params(pkey, N_ACTIONS)

    # 1) Small batch forced through the Pallas kernel (single 8-row tile).
    x_small = jax.random.normal(k1, (8, FC1_IN), dtype=jnp.float32)
    out_small = jax.block_until_ready(
        policy_net_forward(x_small, params, use_pallas=True))
    ref_small = _reference_forward(x_small, params)
    assert out_small.shape == (8, N_ACTIONS)
    assert jnp.allclose(out_small, ref_small, atol=1e-4, rtol=1e-4)

    # 2) Larger, ragged batch: adaptive even tiling -> 2 tiles of 536 rows
    #    (8 padded rows, sliced off in the wrapper), "parallel" grid axis.
    x_big = jax.random.normal(k2, (1064, FC1_IN), dtype=jnp.float32)
    out_big = jax.block_until_ready(policy_net_forward(x_big, params))
    ref_big = _reference_forward(x_big, params)
    assert out_big.shape == (1064, N_ACTIONS)
    assert jnp.allclose(out_big, ref_big, atol=1e-4, rtol=1e-4)

    # 3) bf16 streamed x / W1 (f32 MXU accumulation, f32 W2/h/epilogue).
    out_bf16 = jax.block_until_ready(
        policy_net_forward(x_big, params, use_pallas=True, use_bf16=True))
    assert out_bf16.shape == (1064, N_ACTIONS)
    assert jnp.allclose(out_bf16, ref_big, atol=5e-2, rtol=5e-2)

    # 4) Single 1-D state vector: tiny-batch fast path, squeezed output.
    x_one = jax.random.normal(k3, (FC1_IN,), dtype=jnp.float32)
    out_one = jax.block_until_ready(policy_net_forward(x_one, params))
    ref_one = _reference_forward(x_one, params)
    assert out_one.shape == (N_ACTIONS,)
    assert jnp.allclose(out_one, ref_one, atol=1e-4, rtol=1e-4)

    print("KERNEL_OK")
</pallas_src>

<mosaic_0001>
module attributes {stable_mosaic.version = 11 : i64} {
  func.func @_policy_net_kernel(%arg0: i32, %arg1: memref<8x23xf32, #tpu.memory_space<vmem>>, %arg2: memref<23x32xf32, #tpu.memory_space<vmem>>, %arg3: memref<1x32xf32, #tpu.memory_space<vmem>>, %arg4: memref<32x6xf32, #tpu.memory_space<vmem>>, %arg5: memref<1x6xf32, #tpu.memory_space<vmem>>, %arg6: memref<8x6xf32, #tpu.memory_space<vmem>>) attributes {dimension_semantics = [#tpu.dimension_semantics<parallel>], iteration_bounds = array<i64: 1>, scalar_prefetch = 0 : i64, scratch_operands = 0 : i64, tpu.core_type = #tpu.core_type<tc>, window_params = [{transform_indices = @transform_0, window_bounds = array<i64: 8, 23>}, {pipeline_mode = #tpu.pipeline_mode<synchronous>, transform_indices = @transform_1, window_bounds = array<i64: 23, 32>}, {pipeline_mode = #tpu.pipeline_mode<synchronous>, transform_indices = @transform_2, window_bounds = array<i64: 1, 32>}, {pipeline_mode = #tpu.pipeline_mode<synchronous>, transform_indices = @transform_3, window_bounds = array<i64: 32, 6>}, {pipeline_mode = #tpu.pipeline_mode<synchronous>, transform_indices = @transform_4, window_bounds = array<i64: 1, 6>}, {transform_indices = @transform_5, window_bounds = array<i64: 8, 6>}]} {
    %c0 = arith.constant 0 : index
    %c0_0 = arith.constant 0 : index
    %0 = vector.load %arg1[%c0, %c0_0] : memref<8x23xf32, #tpu.memory_space<vmem>>, vector<8x23xf32>
    %c0_1 = arith.constant 0 : index
    %c0_2 = arith.constant 0 : index
    %1 = vector.load %arg2[%c0_1, %c0_2] : memref<23x32xf32, #tpu.memory_space<vmem>>, vector<23x32xf32>
    %cst = arith.constant dense<0.000000e+00> : vector<8x32xf32>
    %2 = tpu.matmul %0, %1, %cst {dimension_numbers = #tpu.dot_dimension_numbers<[1], [0], [0], [1], [0, 0, 1, 1], [], []>} : vector<8x23xf32>, vector<23x32xf32>, vector<8x32xf32> -> vector<8x32xf32>
    %c0_3 = arith.constant 0 : index
    %c0_4 = arith.constant 0 : index
    %3 = vector.load %arg3[%c0_3, %c0_4] : memref<1x32xf32, #tpu.memory_space<vmem>>, vector<1x32xf32>
    %4 = vector.broadcast %3 : vector<1x32xf32> to vector<8x32xf32>
    %5 = arith.addf %2, %4 : vector<8x32xf32>
    %cst_5 = arith.constant 0.000000e+00 : f32
    %6 = vector.broadcast %cst_5 : f32 to vector<8x32xf32>
    %7 = arith.maximumf %5, %6 : vector<8x32xf32>
    %c0_6 = arith.constant 0 : index
    %c0_7 = arith.constant 0 : index
    %8 = vector.load %arg4[%c0_6, %c0_7] : memref<32x6xf32, #tpu.memory_space<vmem>>, vector<32x6xf32>
    %cst_8 = arith.constant dense<0.000000e+00> : vector<8x6xf32>
    %9 = tpu.matmul %7, %8, %cst_8 {dimension_numbers = #tpu.dot_dimension_numbers<[1], [0], [0], [1], [0, 0, 1, 1], [], []>} : vector<8x32xf32>, vector<32x6xf32>, vector<8x6xf32> -> vector<8x6xf32>
    %c0_9 = arith.constant 0 : index
    %c0_10 = arith.constant 0 : index
    %10 = vector.load %arg5[%c0_9, %c0_10] : memref<1x6xf32, #tpu.memory_space<vmem>>, vector<1x6xf32>
    %11 = vector.broadcast %10 : vector<1x6xf32> to vector<8x6xf32>
    %12 = arith.addf %9, %11 : vector<8x6xf32>
    %c0_11 = arith.constant 0 : index
    %c0_12 = arith.constant 0 : index
    %13 = vector.load %arg6[%c0_11, %c0_12] : memref<8x6xf32, #tpu.memory_space<vmem>>, vector<8x6xf32>
    tpu.vector_store %arg6[%c0_11, %c0_12], %12 {strides = array<i32>} : memref<8x6xf32, #tpu.memory_space<vmem>>, vector<8x6xf32>,
    return
  }
  func.func @transform_0(%arg0: i32) -> (i32, i32) {
    %c0_i32 = arith.constant 0 : i32
    %c0_i32_0 = arith.constant 0 : i32
    return %arg0, %c0_i32 : i32, i32
  }
  func.func @transform_1(%arg0: i32) -> (i32, i32) {
    %c0_i32 = arith.constant 0 : i32
    %c0_i32_0 = arith.constant 0 : i32
    %c0_i32_1 = arith.constant 0 : i32
    return %c0_i32, %c0_i32_0 : i32, i32
  }
  func.func @transform_2(%arg0: i32) -> (i32, i32) {
    %c0_i32 = arith.constant 0 : i32
    %c0_i32_0 = arith.constant 0 : i32
    %c0_i32_1 = arith.constant 0 : i32
    return %c0_i32, %c0_i32_0 : i32, i32
  }
  func.func @transform_3(%arg0: i32) -> (i32, i32) {
    %c0_i32 = arith.constant 0 : i32
    %c0_i32_0 = arith.constant 0 : i32
    %c0_i32_1 = arith.constant 0 : i32
    return %c0_i32, %c0_i32_0 : i32, i32
  }
  func.func @transform_4(%arg0: i32) -> (i32, i32) {
    %c0_i32 = arith.constant 0 : i32
    %c0_i32_0 = arith.constant 0 : i32
    %c0_i32_1 = arith.constant 0 : i32
    return %c0_i32, %c0_i32_0 : i32, i32
  }
  func.func @transform_5(%arg0: i32) -> (i32, i32) {
    %c0_i32 = arith.constant 0 : i32
    %c0_i32_0 = arith.constant 0 : i32
    return %arg0, %c0_i32 : i32, i32
  }
}

</mosaic_0001>

<bundles_post_ra>
// kernel: tpu_custom_call.1
= control target key start
LH: loop header
LB: loop body
LE: loop exit
PB: predicated region body
PF: predicated region fallthrough
CT: control target
= control target key end

     0   :  { %v283_v2 = vmov 0.0|0.0   ;;  %vm284_vm0 = vmmov 0   ;;  %v285_v6 = vmov 0.0   ;;  %s359_s0 = inlined_call_operand.vmem [shape: f32[8,23], index: 0, kind: input, shape index: {}]   ;;  %s360_s1 = inlined_call_operand.vmem [shape: f32[23,32], index: 1, kind: input, shape index: {}]   ;;  %s361_s2 = inlined_call_operand.vmem [shape: f32[1,32], index: 2, kind: input, shape index: {}]   ;;  %s362_s3 = inlined_call_operand.vmem [shape: f32[32,6], index: 3, kind: input, shape index: {}]   ;;  %s363_s4 = inlined_call_operand.vmem [shape: f32[1,6], index: 4, kind: input, shape index: {}]   ;;  %s364_s5 = inlined_call_operand.hbm [shape: f32[8,6], index: 5, kind: output, shape index: {}]  }
   0x1   :  { %v22_v0 = vld [vmem:[%s360_s1] sm:$0xff]  ;;  %v23_v1 = vld [vmem:[%s360_s1 + $0x8] sm:$0xff]  ;;  %246 = vmatprep.subr.bf16.mxu0 %v283_v2  ;;  %249 = vmatprep.subr.bf16.mxu1 %v283_v2 }
   0x2   :  { %v247_v3 = vpack.c.bf16 %v23_v1, %v22_v0  ;;  %v111_v4 = vld [vmem:[%s362_s3] sm:$0xff]  ;;  %v112_v5 = vld [vmem:[%s362_s3 + $0x8] sm:$0xff]  ;;  %232 = vmatprep.mubr.msk.f32.mxu0 %vm284_vm0, %v285_v6  ;;  %243 = vmatprep.mubr.msk.f32.mxu1 %vm284_vm0, %v285_v6 }
   0x3   :  { %v250_v7 = vpack.c.bf16 %v112_v5, %v111_v4 }
   0x4   :  { %10 = vsyncpa [#allocation3], 0  ;;  %248 = vmatpush3.bf16.msra.mxu0 %v247_v3  ;;  %v24_v8 = vld [vmem:[%s360_s1 + $0x10] sm:$0x7f]  ;;  %vm36_vm1 = vcmask 1046528   ;;  %v21_v9 = vld [vmem:[%s359_s0] sm:$0xff] }
   0x5   :  { %230 = vmatprep.subr.mxu0 %v285_v6  ;;  %251 = vmatpush3.bf16.msra.mxu1 %v250_v7  ;;  %vm32_vm2 = vcmask 187392   ;;  %v113_v10 = vld [vmem:[%s362_s3 + $0x10] sm:$0xff]  ;;  %v114_v11 = vld [vmem:[%s362_s3 + $0x18] sm:$0xff]  ;;  %v212_v13 = vld [vmem:[%s361_s2] ss:$0 sm:$0xff]  ;;  %vm122_vm3 = vcmask 261120  }
   0x6   :  { %252 = vmatprep.subr.bf16.mxu1 %v283_v2  ;;  %v253_v12 = vpack.c.bf16 %v114_v11, %v113_v10  ;;  %v215_v18 = vld [vmem:[%s363_s4] ss:$0 sm:$0xff]  ;;  %s286_s11 = smov [#allocation2]   ;;  %vm196_vm4 = vcmask 48128  }
   0x7   :  { %s204_s12 = sshll.u32 %s286_s11, 4  ;;  %s205_s12 = int_to_ptr.vmem [resolvable:$true] %s204_s12 }
   0x8   :  { %231 = vmatpush3.msk.msra.mxu0 %vm36_vm1, %v24_v8  ;;  %s259_s3 = scalar_lea.vmem %s205_s12, 128  ;;  %p264_p1 = scmp.lt.s32.totalorder %s205_s12, %s205_s12 }
   0x9   :  { %233 = vmatmul.mubr.msk.f32.vlgmr.msra.gmra.mrb[0].mxu0 %vm32_vm2, %v21_v9  ;;  %254 = vmatpush3.bf16.msra.mxu1 %v253_v12  ;;  %p260_p0 = scmp.ne.s32.totalorder %s205_s12, %s259_s3  ;;  %p265_p2 = scmp.lt.s32.totalorder %s259_s3, %s259_s3 }
   0xb   :  { %p266_p3 = por %p265_p2, %p264_p1 }
   0xd   :  { %p267_p4 = pnand %p266_p3, %p260_p0 }
  0xdc   :  { %v106_v14 = vpop.f32.mrb[0].mxu0 }
  0xdd   :  { %v107_v15 = vadd.f32 %v212_v13, %v106_v14  ;;  %v234_v16 = vpop.f32.mrb[1].mxu0 }
  0xdf   :  { %v110_v17 = vmax.f32 %v107_v15, 0.0 }
  0xe1   :  { %244 = vmatmul.mubr.msk.f32.vlgmr.msra.gmra.mrb[0].mxu1 %vm122_vm3, %v110_v17 }
 0x1b4   :  { %v192_v19 = vpop.f32.mrb[0].mxu1 }
 0x1b5   :  { %v193_v20 = vadd.f32 %v215_v18, %v192_v19  ;;  %v245_v21 = vpop.f32.mrb[1].mxu1 }
 0x1b7   :  { %197 = vst.msk [vmem:[#allocation2] sm:$0xff] %vm196_vm4, %v193_v20 }
 0x1b8   :  { %270 = shalt.err (!%p267_p4)
}
 0x1b9   :  { %s271_s14 = scalar_lea.hbm %s364_s5, 128 }
 0x1ba   :  { %p272_p5 = scmp.ne.s32.totalorder %s364_s5, %s271_s14  ;;  %p275_p6 = scmp.lt.u32.totalorder %s271_s14, %s364_s5 }
 0x1bc   :  { %p277_p7 = pnand %p275_p6, %p272_p5 }
 0x1be   :  { %280 = shalt.err (!%p277_p7)
}
 0x1bf   :  { %207 = dma.vmem_to_hbm [thread:$0]  %s205_s12, 128, %s364_s5, [#allocation3]  }
 0x1c0   :  { %281 = dma.done.wait [#allocation3], 128  }
 0x1c1   :  { %282 = vsyncadd [#allocation3], 4294967168 }
 0x1c2   :  { %211 = vsyncpa [#allocation3], 1 }

</bundles_post_ra>
